<compile_context>
chip_gen: v6e
topology: v6e:2x2x1
jax: 0.10.0
libtpu: 0.0.40
codegen_flags: <defaults>
</compile_context>

<pallas_src>
import jax
import jax.numpy as jnp
from jax.experimental import pallas as pl
from jax.experimental.pallas import tpu as pltpu


def _decoder_kernel(x_ref, c_ref, o_ref):
    # x_ref: (bb, ts, N)  raw NHWC logits (lane-dense, N = S*A*5)
    # c_ref: (3,  ts, N)  baked constants:
    #          plane 0: additive term   (xy_grid * scale on dx/dy lanes, 0 else)
    #          plane 1: multiplicative  (scale | anchors*scale | 1)
    #          plane 2: exp-lane mask   (1.0 on dw/dh lanes, 0.0 else)
    # o_ref: (bb, ts, N)  decoded output
    x = x_ref[...].astype(jnp.float32)
    add = c_ref[0]
    mult = c_ref[1]
    is_exp = c_ref[2]

    e = jnp.exp(x)                                    # one exp shared by both paths
    sig = jnp.where(x > 20.0, 1.0, e / (1.0 + e))     # inf/inf-safe sigmoid
    val = jnp.where(is_exp > 0.5, e, sig)             # dw/dh lanes keep exp (may be +inf, like ref)
    o_ref[...] = (val * mult + add).astype(o_ref.dtype)


def _build_consts(S, N, A, anchors, scale):
    """(3, S, N) float32 constant planes: [additive, multiplicative, is_exp]."""
    lane = jnp.arange(N, dtype=jnp.int32)
    comp = lane % 5                                   # component id within (A,5)
    col = (lane // (A * 5)).astype(jnp.float32)       # x-grid column (spatial w) per lane
    a_idx = (lane // 5) % A                           # anchor index per lane
    row = jnp.arange(S, dtype=jnp.float32)[:, None]   # y-grid row (spatial h), sublane axis

    add = jnp.where(comp[None, :] == 0, (col * scale)[None, :],
          jnp.where(comp[None, :] == 1, row * scale, 0.0)).astype(jnp.float32)   # (S, N)

    anc = anchors.astype(jnp.float32)                 # (A, 2)
    wh_mult = anc[a_idx, jnp.clip(comp - 2, 0, 1)] * scale        # valid where comp in {2,3}
    mult_lane = jnp.where(comp < 2, jnp.float32(scale),
                jnp.where(comp < 4, wh_mult, jnp.float32(1.0))).astype(jnp.float32)
    mult = jnp.broadcast_to(mult_lane[None, :], (S, N))

    is_exp = jnp.broadcast_to(((comp >= 2) & (comp < 4)).astype(jnp.float32)[None, :], (S, N))

    return jnp.stack([add, mult, is_exp], axis=0)     # (3, S, N)


def _pick_tiles(B, S, N):
    """Choose (ts, bb): sublane tile over S and batch fold, preferring >= 4 grid
    steps (>= 2 per v7x TensorCore) and then the largest block under a 4 MiB cap
    (double-buffered in+out stays <= ~16 MiB, safe on v7x's smaller VMEM)."""
    block_cap = 4 << 20
    ts_cands = [d for d in range(1, S + 1) if S % d == 0 and (d % 8 == 0 or d == S)]
    bb_cands = [d for d in range(1, B + 1) if B % d == 0]
    best = None
    for ts in ts_cands:
        for bb in bb_cands:
            blk = bb * ts * N * 4
            if blk > block_cap:
                continue
            steps = (S // ts) * (B // bb)
            key = (steps >= 4, blk, ts)
            if best is None or key > best[0]:
                best = (key, ts, bb)
    if best is None:                                  # pathological huge N: smallest legal tile
        return ts_cands[0], 1
    return best[1], best[2]


def out_decoder(output_nchw, anchors, scale):
    """output_nchw: [B, A*5, S, S]; anchors: [A, 2]; returns [B, S, S, A, 5] float32."""
    B, C, S, S2 = output_nchw.shape
    A = anchors.shape[0]
    assert C == A * 5 and S2 == S
    N = S * A * 5
    scale = float(scale)

    # NCHW -> NHWC, merged into one lane-dense trailing dim. Kept as the direct
    # producer of operand 0 so allow_input_fusion can fold it into the kernel's
    # input DMA (no separately materialized transposed buffer in HBM).
    x = jnp.transpose(output_nchw, (0, 2, 3, 1)).reshape(B, S, N)

    consts = _build_consts(S, N, A, anchors, scale)   # (3, S, N), tiny, resident-ish

    ts, bb = _pick_tiles(B, S, N)
    grid = (S // ts, B // bb)                         # S-tiles outer, batch inner
                                                      # (consts block index changes least often)

    elems = B * S * N
    cost = pl.CostEstimate(
        flops=6 * elems,
        transcendentals=elems,
        bytes_accessed=elems * output_nchw.dtype.itemsize + elems * 4 + 3 * S * N * 4,
    )

    out = pl.pallas_call(
        _decoder_kernel,
        out_shape=jax.ShapeDtypeStruct((B, S, N), jnp.float32),
        grid_spec=pltpu.PrefetchScalarGridSpec(
            num_scalar_prefetch=0,
            grid=grid,
            in_specs=[
                pl.BlockSpec((bb, ts, N), lambda si, bi: (bi, si, 0)),
                pl.BlockSpec((3, ts, N), lambda si, bi: (0, si, 0)),   # baked constants
            ],
            out_specs=pl.BlockSpec((bb, ts, N), lambda si, bi: (bi, si, 0)),
        ),
        compiler_params=pltpu.CompilerParams(
            dimension_semantics=("parallel", "parallel"),
            allow_input_fusion=[True, False],         # fuse the NCHW->NHWC transpose into operand 0
            vmem_limit_bytes=32 * 1024 * 1024,
        ),
        cost_estimate=cost,
    )(x, consts)

    return out.reshape(B, S, S, A, 5)                 # free view of the contiguous layout


def out_decoder_ref(output_nchw, anchors, scale):
    """Pure-JAX reference mirroring the PyTorch forward."""
    B, C, S, _ = output_nchw.shape
    A = anchors.shape[0]
    o = jnp.transpose(output_nchw, (0, 2, 3, 1)).reshape(B, S, S, A, 5)
    dxdy, dwdh, conf = o[..., 0:2], o[..., 2:4], o[..., 4:5]
    y = jnp.tile(jnp.arange(S, dtype=jnp.float32)[:, None], (1, S))
    xg = jnp.tile(jnp.arange(S, dtype=jnp.float32)[None, :], (S, 1))
    xy_grid = jnp.stack([xg, y], axis=-1)                            # [S, S, 2]
    xy_grid = jnp.broadcast_to(xy_grid[None, :, :, None, :], (B, S, S, A, 2))
    oxy = (jax.nn.sigmoid(dxdy) + xy_grid) * scale
    owh = jnp.exp(dwdh) * anchors.astype(jnp.float32) * scale
    oconf = jax.nn.sigmoid(conf)
    return jnp.concatenate([oxy, owh, oconf], axis=-1)


if __name__ == "__main__":
    key = jax.random.PRNGKey(0)
    B, A, S = 2, 3, 16
    scale = 8.0

    k1, _ = jax.random.split(key)
    output = jax.random.normal(k1, (B, A * 5, S, S), dtype=jnp.float32)
    # deterministic synthetic anchors, shape [A, 2]
    anchors = (jnp.arange(A * 2, dtype=jnp.float32).reshape(A, 2) * 0.25 + 0.5)

    # jit so the NCHW->NHWC transpose and the pallas_call share one XLA program
    # (required for allow_input_fusion to have anything to fuse).
    decode = jax.jit(lambda o, a: out_decoder(o, a, scale))

    out = decode(output, anchors)
    out = jax.block_until_ready(out)

    ref = out_decoder_ref(output, anchors, scale)
    assert out.shape == (B, S, S, A, 5)
    assert jnp.allclose(out, ref, rtol=1e-5, atol=2e-5), "mismatch vs reference"

    print("KERNEL_OK")
</pallas_src>

<mosaic_0001>
module attributes {stable_mosaic.version = 11 : i64} {
  func.func @_decoder_kernel(%arg0: i32, %arg1: i32, %arg2: memref<1x8x240xf32, #tpu.memory_space<vmem>>, %arg3: memref<3x8x240xf32, #tpu.memory_space<vmem>>, %arg4: memref<1x8x240xf32, #tpu.memory_space<vmem>>) attributes {dimension_semantics = [#tpu.dimension_semantics<parallel>, #tpu.dimension_semantics<parallel>], iteration_bounds = array<i64: 2, 2>, scalar_prefetch = 0 : i64, scratch_operands = 0 : i64, tpu.core_type = #tpu.core_type<tc>, window_params = [{transform_indices = @transform_0, window_bounds = array<i64: 1, 8, 240>}, {transform_indices = @transform_1, window_bounds = array<i64: 3, 8, 240>}, {transform_indices = @transform_2, window_bounds = array<i64: 1, 8, 240>}]} {
    %c0 = arith.constant 0 : index
    %c0_0 = arith.constant 0 : index
    %c0_1 = arith.constant 0 : index
    %0 = vector.load %arg2[%c0, %c0_0, %c0_1] : memref<1x8x240xf32, #tpu.memory_space<vmem>>, vector<1x8x240xf32>
    %c0_2 = arith.constant 0 : index
    %c0_3 = arith.constant 0 : index
    %c0_4 = arith.constant 0 : index
    %1 = vector.load %arg3[%c0_2, %c0_3, %c0_4] : memref<3x8x240xf32, #tpu.memory_space<vmem>>, vector<1x8x240xf32>
    %2 = vector.shape_cast %1 : vector<1x8x240xf32> to vector<8x240xf32>
    %c1 = arith.constant 1 : index
    %c0_5 = arith.constant 0 : index
    %c0_6 = arith.constant 0 : index
    %3 = vector.load %arg3[%c1, %c0_5, %c0_6] : memref<3x8x240xf32, #tpu.memory_space<vmem>>, vector<1x8x240xf32>
    %4 = vector.shape_cast %3 : vector<1x8x240xf32> to vector<8x240xf32>
    %c2 = arith.constant 2 : index
    %c0_7 = arith.constant 0 : index
    %c0_8 = arith.constant 0 : index
    %5 = vector.load %arg3[%c2, %c0_7, %c0_8] : memref<3x8x240xf32, #tpu.memory_space<vmem>>, vector<1x8x240xf32>
    %6 = vector.shape_cast %5 : vector<1x8x240xf32> to vector<8x240xf32>
    %7 = math.exp %0 : vector<1x8x240xf32>
    %cst = arith.constant 2.000000e+01 : f32
    %8 = vector.broadcast %cst : f32 to vector<1x8x240xf32>
    %9 = arith.cmpf ogt, %0, %8 : vector<1x8x240xf32>
    %cst_9 = arith.constant 1.000000e+00 : f32
    %10 = vector.broadcast %cst_9 : f32 to vector<1x8x240xf32>
    %11 = arith.addf %10, %7 : vector<1x8x240xf32>
    %12 = arith.divf %7, %11 : vector<1x8x240xf32>
    %cst_10 = arith.constant 1.000000e+00 : f32
    %13 = vector.broadcast %cst_10 : f32 to vector<1x8x240xf32>
    %14 = arith.select %9, %13, %12 : vector<1x8x240xi1>, vector<1x8x240xf32>
    %cst_11 = arith.constant 5.000000e-01 : f32
    %15 = vector.broadcast %cst_11 : f32 to vector<8x240xf32>
    %16 = arith.cmpf ogt, %6, %15 : vector<8x240xf32>
    %17 = vector.shape_cast %16 : vector<8x240xi1> to vector<1x8x240xi1>
    %18 = arith.select %17, %7, %14 : vector<1x8x240xi1>, vector<1x8x240xf32>
    %19 = vector.shape_cast %4 : vector<8x240xf32> to vector<1x8x240xf32>
    %20 = arith.mulf %18, %19 : vector<1x8x240xf32>
    %21 = vector.shape_cast %2 : vector<8x240xf32> to vector<1x8x240xf32>
    %22 = arith.addf %20, %21 : vector<1x8x240xf32>
    %c0_12 = arith.constant 0 : index
    %c0_13 = arith.constant 0 : index
    %c0_14 = arith.constant 0 : index
    %23 = vector.load %arg4[%c0_12, %c0_13, %c0_14] : memref<1x8x240xf32, #tpu.memory_space<vmem>>, vector<1x8x240xf32>
    tpu.vector_store %arg4[%c0_12, %c0_13, %c0_14], %22 {strides = array<i32>} : memref<1x8x240xf32, #tpu.memory_space<vmem>>, vector<1x8x240xf32>,
    return
  }
  func.func @transform_0(%arg0: i32, %arg1: i32) -> (i32, i32, i32) {
    %c0_i32 = arith.constant 0 : i32
    %c0_i32_0 = arith.constant 0 : i32
    return %arg1, %arg0, %c0_i32 : i32, i32, i32
  }
  func.func @transform_1(%arg0: i32, %arg1: i32) -> (i32, i32, i32) {
    %c0_i32 = arith.constant 0 : i32
    %c0_i32_0 = arith.constant 0 : i32
    %c0_i32_1 = arith.constant 0 : i32
    return %c0_i32, %arg0, %c0_i32_0 : i32, i32, i32
  }
  func.func @transform_2(%arg0: i32, %arg1: i32) -> (i32, i32, i32) {
    %c0_i32 = arith.constant 0 : i32
    %c0_i32_0 = arith.constant 0 : i32
    return %arg1, %arg0, %c0_i32 : i32, i32, i32
  }
}

</mosaic_0001>

<bundles_post_ra>
// kernel: _lambda_.1
= control target key start
LH: loop header
LB: loop body
LE: loop exit
PB: predicated region body
PF: predicated region fallthrough
CT: control target
= control target key end

     0   :  { %s535_s9 = smov 0   ;;  %s537_s10 = smov 0   ;;  %s633_s0 = inlined_call_operand.vmem [shape: f32[2,16,240], index: 0, kind: input, shape index: {}]   ;;  %s634_s1 = inlined_call_operand.vmem [shape: f32[3,16,240], index: 1, kind: input, shape index: {}]   ;;  %s635_s2 = inlined_call_operand.vmem [shape: f32[2,16,240], index: 2, kind: output, shape index: {}]  }
   0x1   :  { %s539_s11 = smov 0   ;;  %s541_s12 = smov 0  }
   0x2   :  { %s543_s13 = smov 0   ;;  %s545_s14 = smov 0  }
   0x3   :  { %s547_s15 = smov 0  }
   0x4 LB: > { %s21_s16 = sadd.s32 1, %s510_s13  ;;  %s24_s17 = sadd.s32 1, %s514_s14  ;;  %s518_s15 = sphi %s547_s15, %s12_s15   ;;  %s514_s14 = sphi %s545_s14, %s641_s14   ;;  %s510_s13 = sphi %s543_s13, %s640_s13   ;;  %s506_s12 = sphi %s541_s12, %s639_s12   ;;  %s502_s11 = sphi %s539_s11, %s638_s11   ;;  %s498_s10 = sphi %s537_s10, %s637_s10   ;;  %s494_s9 = sphi %s535_s9, %s636_s9  }
   0x5   : > { %p22_p0 = scmp.ge.s32.totalorder %s21_s16, 2  ;;  %p66_p1 = scmp.ne.s32.totalorder %s498_s10, %s494_s9 }
   0x6   : > { %p67_p2 = scmp.eq.s32.totalorder %s518_s15, 0  ;;  %s59_s19 = sadd.s32 1, %s498_s10 }
   0x7   : > { %s643_s16 = smov (%p22_p0, %s21_s16), 0  ;;  %s645_s17 = smov (!%p22_p0, %s24_s17), %s514_s14 }
   0x8   : > { %p68_p3 = por %p67_p2, %p66_p1  ;;  %p26_p4 = scmp.ge.s32.totalorder %s645_s17, 2 }
   0x9   : > { %p381_p6 = scmp.ge.s32.totalorder %s518_s15, 4 }
   0xa   : > { %s647_s17 = smov (%p26_p4, %s645_s17), 0 }
   0xb   : > { %s56_s18 = ssub.s32 %s514_s14, %s647_s17  ;;  %120 = sbr.rel (%p381_p6) target bundleno = 23 (0x17), region = 16 }
   0xc   : > { %p57_p5 = scmp.eq.s32.totalorder %s56_s18, 0 }
   0xe   : > { %s584_s20 = scalar_select %p57_p5, %s498_s10, %s59_s19  }
  0x10   : > { %135 = sbr.rel (!%p68_p3) target bundleno = 23 (0x17), region = 24  ;;  %s137_s21 = sand.u32 (%p68_p3), 1, %s498_s10  }
  0x11   : > { %s397_s22 = sshll.u32 (%p68_p3), %s514_s14, 4  ;;  %s398_s23 = smul.u32 (%p68_p3), 48, %s137_s21 }
  0x12   : > { %s142_s26 = scalar_lea.vmem (%p68_p3), %s634_s1, %s397_s22 }
  0x13   : > { %v155_v0 = vld [vmem:[%s142_s26] sm:$0xff] (%p68_p3)  ;;  %v157_v1 = vld [vmem:[%s142_s26 + $0x8] sm:$0xff] (%p68_p3)  ;;  %s139_s27 = scalar_lea.vmem (%p68_p3), [#allocation2], %s398_s23 }
  0x14   : > { %v159_v2 = vld [vmem:[%s142_s26 + $0x20] sm:$0xff] (%p68_p3)  ;;  %v161_v3 = vld [vmem:[%s142_s26 + $0x28] sm:$0xff] (%p68_p3)  ;;  %156 = vst [vmem:[%s139_s27] sm:$0xff] (%p68_p3), %v155_v0  ;;  %158 = vst [vmem:[%s139_s27 + $0x8] sm:$0xff] (%p68_p3), %v157_v1 }
  0x15   : > { %v163_v4 = vld [vmem:[%s142_s26 + $0x40] sm:$0xff]  ;;  %v165_v5 = vld [vmem:[%s142_s26 + $0x48] sm:$0xff]  ;;  %160 = vst [vmem:[%s139_s27 + $0x10] sm:$0xff] %v159_v2  ;;  %162 = vst [vmem:[%s139_s27 + $0x18] sm:$0xff] %v161_v3 }
  0x16   : > { %164 = vst [vmem:[%s139_s27 + $0x20] sm:$0xff] %v163_v4  ;;  %166 = vst [vmem:[%s139_s27 + $0x28] sm:$0xff] %v165_v5 }
  0x17 PF: > { %p384_p7 = scmp.ge.s32.totalorder %s518_s15, 1  ;;  %p171_p8 = scmp.lt.s32.totalorder %s518_s15, 5 }
  0x19   : > { %p172_p9 = pnand %p384_p7, %p171_p8 }
  0x1a   : > { %p212_p10 = scmp.lt.s32.totalorder (!%p172_p9), %s502_s11, 1  ;;  %p214_p11 = scmp.lt.s32.totalorder (!%p172_p9), %s506_s12, 1 }
  0x1b   : > { %175 = sbr.rel (%p172_p9) target bundleno = 80 (0x50), region = 47  ;;  %s178_s7 = sand.u32 (!%p172_p9), 1, %s494_s9  }
  0x1c   : > { %s399_s8 = smul.u32 (!%p172_p9), 48, %s178_s7 }
  0x20   : > { %s649_s11 = smov (!%p212_p10, %s502_s11), 1  ;;  %s651_s12 = smov (!%p214_p11, %s506_s12), 1  ;;  %vm263_vm4 = vcmask 916480  }
  0x21   : > { %s386_s28 = sshll.u32 %s649_s11, 2  ;;  %s385_s29 = sshll.u32 %s651_s12, 1 }
  0x22   : > { %s598_s30 = sadd.s32 %s386_s28, %s385_s29  ;;  %s180_s11 = scalar_lea.vmem [#allocation2], %s399_s8 }
  0x23   : > { %s387_s3 = sshll.u32 %s598_s30, 3  ;;  %v393_v14 = vld [vmem:[%s180_s11 + $0x20] sm:$0xff]  ;;  %v394_v15 = vld [vmem:[%s180_s11 + $0x28] sm:$0xff]  ;;  %v391_v19 = vld [vmem:[%s180_s11 + $0x10] sm:$0xff] }
  0x24   : > { %s220_s6 = scalar_lea.vmem %s633_s0, %s387_s3  ;;  %vm254_vm2 = vcmp.gt.f32.partialorder %v393_v14, 0.5  ;;  %vm255_vm3 = vcmp.gt.f32.partialorder %v394_v15, 0.5  ;;  %v392_v22 = vld [vmem:[%s180_s11 + $0x18] sm:$0xff]  ;;  %v232_v23 = vld [vmem:[%s180_s11] sm:$0xff]  ;;  %v233_v27 = vld [vmem:[%s180_s11 + $0x8] sm:$0xff]  ;;  %s229_s18 = scalar_lea.vmem %s635_s2, %s387_s3 }
  0x25   : > { %v230_v6 = vld [vmem:[%s220_s6] sm:$0xff]  ;;  %v231_v7 = vld [vmem:[%s220_s6 + $0x8] sm:$0xff] }
  0x26   : > { %v240_v8 = vmul.f32 1.442695, %v230_v6  ;;  %v242_v9 = vmul.f32 1.442695, %v231_v7  ;;  %vm244_vm0 = vcmp.gt.f32.partialorder %v230_v6, 20.0  ;;  %vm245_vm1 = vcmp.gt.f32.partialorder %v231_v7, 20.0 }
  0x28   : > { %456 = vpow2.f32 %v240_v8 }
  0x29   : > { %458 = vpow2.f32 %v242_v9 }
  0x35   : > { %v457_v10 = vpop.eup %456 }
  0x36   : > { %v459_v11 = vpop.eup %458  ;;  %v246_v12 = vadd.f32 1.0, %v457_v10 }
  0x37   : > { %v247_v13 = vadd.f32 1.0, %v459_v11 }
  0x38   : > { %460 = vrcp.f32 %v246_v12 }
  0x39   : > { %462 = vrcp.f32 %v247_v13 }
  0x45   : > { %v461_v16 = vpop.eup %460 }
  0x46   : > { %v463_v17 = vpop.eup %462  ;;  %v249_v18 = vmul.f32 %v461_v16, %v457_v10 }
  0x47   : > { %v251_v20 = vmul.f32 %v463_v17, %v459_v11 }
  0x48   : > { %v252_v21 = vsel %vm244_vm0, 1.0, %v249_v18 }
  0x49   : > { %v253_v24 = vsel %vm245_vm1, 1.0, %v251_v20  ;;  %v256_v25 = vsel %vm254_vm2, %v457_v10, %v252_v21 }
  0x4a   : > { %v258_v26 = vmul.f32 %v391_v19, %v256_v25  ;;  %v257_v28 = vsel %vm255_vm3, %v459_v11, %v253_v24 }
  0x4b   : > { %v259_v29 = vmul.f32 %v392_v22, %v257_v28 }
  0x4c   : > { %v260_v30 = vadd.f32 %v258_v26, %v232_v23 }
  0x4d   : > { %v261_v31 = vadd.f32 %v259_v29, %v233_v27 }
  0x4e   : > { %262 = vst [vmem:[%s229_s18] sm:$0xff] %v260_v30 }
  0x4f   : > { %264 = vst.msk [vmem:[%s229_s18 + $0x8] sm:$0xff] %vm263_vm4, %v261_v31 }
  0x50 PF: > { %s12_s15 = sadd.s32 1, %s518_s15   ;;  %s636_s9 = smov %s498_s10 }
  0x51   : > { %p9_p12 = scmp.ge.s32.totalorder %s12_s15, 6   ;;  %s637_s10 = smov %s584_s20 }
  0x52   : > { %s638_s11 = smov %s510_s13  ;;  %s639_s12 = smov %s514_s14 }
  0x53   : > { %s640_s13 = smov %s643_s16  ;;  %s641_s14 = smov %s647_s17 }
  0x54   :  { %11 = sbr.rel (!%p9_p12) target bundleno = 4 (0x4), region = 91 }

</bundles_post_ra>
